<compile_context>
chip_gen: v7x
topology: tpu7x:2x2x1
jax: 0.10.0
libtpu: 0.0.40
codegen_flags: <defaults>
</compile_context>

<pallas_src>
import functools

import jax
import jax.numpy as jnp
from jax.experimental import pallas as pl
from jax.experimental.pallas import tpu as pltpu


def _round_up(x, m):
    return ((x + m - 1) // m) * m


def dqn_kernel(x_ref, w1_ref, b1_ref, w2_ref, b2_ref, w3_ref, b3_ref, o_ref):
    # x_ref: (TM, D_in) f32 (cast to bf16 in-kernel); w*_ref: bf16 MXU operands;
    # b*_ref: (1, N) f32 (added to the f32 accumulator); o_ref: (TM, out_dim) f32.
    x = x_ref[...].astype(jnp.bfloat16)
    h1 = jnp.dot(x, w1_ref[...], preferred_element_type=jnp.float32) + b1_ref[...]
    h1 = jnp.maximum(h1, 0.0)                                              # ReLU in f32
    h2 = jnp.dot(h1.astype(jnp.bfloat16), w2_ref[...],
                 preferred_element_type=jnp.float32) + b2_ref[...]
    h2 = jnp.maximum(h2, 0.0)                                              # ReLU in f32
    o_ref[...] = (jnp.dot(h2.astype(jnp.bfloat16), w3_ref[...],
                          preferred_element_type=jnp.float32)
                  + b3_ref[...]).astype(o_ref.dtype)


def _pick_block_m(batch):
    """Batch tile: large enough to amortize per-step overhead, >=2 tiles when the
    batch allows (v7x megacore), multiple of 128 (sublane/lane friendly)."""
    half = -(-batch // 2)  # cdiv(batch, 2)
    return int(min(1024, max(128, _round_up(half, 128))))


@functools.partial(jax.jit, static_argnames=("block_m",))
def dqn_forward(state, params, block_m=None):
    """state: (B, input_dim) f32.  params: dict of w1,b1,w2,b2,w3,b3 (f32, (in,out) layout)."""
    B, d_in = state.shape
    out_dim = params["w3"].shape[1]

    if block_m is None:
        block_m = _pick_block_m(B)
    assert block_m % 8 == 0, "block_m must be a multiple of 8 (sublane rule)"

    # Cast MXU operands to bf16; keep biases (added to the f32 accumulator) in f32.
    w1 = params["w1"].astype(jnp.bfloat16)
    w2 = params["w2"].astype(jnp.bfloat16)
    w3 = params["w3"].astype(jnp.bfloat16)
    b1 = params["b1"].astype(jnp.float32)
    b2 = params["b2"].astype(jnp.float32)
    b3 = params["b3"].astype(jnp.float32)

    grid = (pl.cdiv(B, block_m),)  # ragged last tile handled by Pallas partial blocks

    resident = lambda arr: pl.BlockSpec(arr.shape, lambda i: (0, 0))  # VMEM-resident weights

    out = pl.pallas_call(
        dqn_kernel,
        out_shape=jax.ShapeDtypeStruct((B, out_dim), jnp.float32),
        grid=grid,
        in_specs=[
            pl.BlockSpec((block_m, d_in), lambda i: (i, 0)),   # activations: tiled over batch
            resident(w1), resident(b1),
            resident(w2), resident(b2),
            resident(w3), resident(b3),
        ],
        out_specs=pl.BlockSpec((block_m, out_dim), lambda i: (i, 0)),
        compiler_params=pltpu.CompilerParams(
            dimension_semantics=("parallel",)),
    )(state, w1, b1, w2, b2, w3, b3)

    return out


def init_params(key, input_dim, output_dim):
    """Deterministic init matching the PyTorch module's layer shapes (stored transposed)."""
    ks = jax.random.split(key, 6)

    def lin(kw, kb, fan_in, fan_out):
        bound = 1.0 / jnp.sqrt(fan_in)
        w = jax.random.uniform(kw, (fan_in, fan_out), jnp.float32, -bound, bound)
        b = jax.random.uniform(kb, (1, fan_out), jnp.float32, -bound, bound)
        return w, b

    w1, b1 = lin(ks[0], ks[1], input_dim, 128)
    w2, b2 = lin(ks[2], ks[3], 128, 256)
    w3, b3 = lin(ks[4], ks[5], 256, output_dim)
    return {"w1": w1, "b1": b1, "w2": w2, "b2": b2, "w3": w3, "b3": b3}


def reference_forward_f32(state, p):
    h1 = jnp.maximum(state @ p["w1"] + p["b1"], 0.0)
    h2 = jnp.maximum(h1 @ p["w2"] + p["b2"], 0.0)
    return h2 @ p["w3"] + p["b3"]


def reference_forward_bf16(state, p):
    """Same bf16-operand / f32-accumulate arithmetic as the kernel (for a tight check)."""
    bf = jnp.bfloat16
    h1 = jnp.maximum(
        jnp.dot(state.astype(bf), p["w1"].astype(bf),
                preferred_element_type=jnp.float32) + p["b1"], 0.0)
    h2 = jnp.maximum(
        jnp.dot(h1.astype(bf), p["w2"].astype(bf),
                preferred_element_type=jnp.float32) + p["b2"], 0.0)
    return jnp.dot(h2.astype(bf), p["w3"].astype(bf),
                   preferred_element_type=jnp.float32) + p["b3"]


if __name__ == "__main__":
    key = jax.random.PRNGKey(0)
    k_param, k_state = jax.random.split(key)

    batch = 200        # not a multiple of the 128-row tile -> exercises the ragged last tile
    input_dim = 32     # corresponds to input_dim[0] in the PyTorch module
    output_dim = 4

    params = init_params(k_param, input_dim, output_dim)
    state = jax.random.normal(k_state, (batch, input_dim), jnp.float32)

    out = dqn_forward(state, params)
    out = jax.block_until_ready(out)
    assert out.shape == (batch, output_dim)

    ref_bf16 = reference_forward_bf16(state, params)
    assert jnp.allclose(out, ref_bf16, atol=1e-2, rtol=1e-2), "mismatch vs bf16 JAX reference"

    ref_f32 = reference_forward_f32(state, params)
    assert jnp.allclose(out, ref_f32, atol=0.15, rtol=0.05), "mismatch vs f32 JAX reference"

    print("KERNEL_OK")
</pallas_src>

<mosaic_0001>
module attributes {stable_mosaic.version = 11 : i64} {
  func.func @dqn_kernel(%arg0: i32, %arg1: memref<128x32xf32, #tpu.memory_space<vmem>>, %arg2: memref<32x128xbf16, #tpu.memory_space<vmem>>, %arg3: memref<1x128xf32, #tpu.memory_space<vmem>>, %arg4: memref<128x256xbf16, #tpu.memory_space<vmem>>, %arg5: memref<1x256xf32, #tpu.memory_space<vmem>>, %arg6: memref<256x4xbf16, #tpu.memory_space<vmem>>, %arg7: memref<1x4xf32, #tpu.memory_space<vmem>>, %arg8: memref<128x4xf32, #tpu.memory_space<vmem>>) attributes {dimension_semantics = [#tpu.dimension_semantics<parallel>], iteration_bounds = array<i64: 2>, scalar_prefetch = 0 : i64, scratch_operands = 0 : i64, tpu.core_type = #tpu.core_type<tc>, window_params = [{transform_indices = @transform_0, window_bounds = array<i64: 128, 32>}, {pipeline_mode = #tpu.pipeline_mode<synchronous>, transform_indices = @transform_1, window_bounds = array<i64: 32, 128>}, {pipeline_mode = #tpu.pipeline_mode<synchronous>, transform_indices = @transform_2, window_bounds = array<i64: 1, 128>}, {pipeline_mode = #tpu.pipeline_mode<synchronous>, transform_indices = @transform_3, window_bounds = array<i64: 128, 256>}, {pipeline_mode = #tpu.pipeline_mode<synchronous>, transform_indices = @transform_4, window_bounds = array<i64: 1, 256>}, {pipeline_mode = #tpu.pipeline_mode<synchronous>, transform_indices = @transform_5, window_bounds = array<i64: 256, 4>}, {pipeline_mode = #tpu.pipeline_mode<synchronous>, transform_indices = @transform_6, window_bounds = array<i64: 1, 4>}, {transform_indices = @transform_7, window_bounds = array<i64: 128, 4>}]} {
    %c0 = arith.constant 0 : index
    %c0_0 = arith.constant 0 : index
    %0 = vector.load %arg1[%c0, %c0_0] : memref<128x32xf32, #tpu.memory_space<vmem>>, vector<128x32xf32>
    %1 = arith.truncf %0 : vector<128x32xf32> to vector<128x32xbf16>
    %c0_1 = arith.constant 0 : index
    %c0_2 = arith.constant 0 : index
    %2 = vector.load %arg2[%c0_1, %c0_2] : memref<32x128xbf16, #tpu.memory_space<vmem>>, vector<32x128xbf16>
    %cst = arith.constant dense<0.000000e+00> : vector<128x128xf32>
    %3 = tpu.matmul %1, %2, %cst {dimension_numbers = #tpu.dot_dimension_numbers<[1], [0], [0], [1], [0, 0, 1, 1], [], []>} : vector<128x32xbf16>, vector<32x128xbf16>, vector<128x128xf32> -> vector<128x128xf32>
    %c0_3 = arith.constant 0 : index
    %c0_4 = arith.constant 0 : index
    %4 = vector.load %arg3[%c0_3, %c0_4] : memref<1x128xf32, #tpu.memory_space<vmem>>, vector<1x128xf32>
    %5 = vector.broadcast %4 : vector<1x128xf32> to vector<128x128xf32>
    %6 = arith.addf %3, %5 : vector<128x128xf32>
    %cst_5 = arith.constant 0.000000e+00 : f32
    %7 = vector.broadcast %cst_5 : f32 to vector<128x128xf32>
    %8 = arith.maximumf %6, %7 : vector<128x128xf32>
    %9 = arith.truncf %8 : vector<128x128xf32> to vector<128x128xbf16>
    %c0_6 = arith.constant 0 : index
    %c0_7 = arith.constant 0 : index
    %10 = vector.load %arg4[%c0_6, %c0_7] : memref<128x256xbf16, #tpu.memory_space<vmem>>, vector<128x256xbf16>
    %cst_8 = arith.constant dense<0.000000e+00> : vector<128x256xf32>
    %11 = tpu.matmul %9, %10, %cst_8 {dimension_numbers = #tpu.dot_dimension_numbers<[1], [0], [0], [1], [0, 0, 1, 1], [], []>} : vector<128x128xbf16>, vector<128x256xbf16>, vector<128x256xf32> -> vector<128x256xf32>
    %c0_9 = arith.constant 0 : index
    %c0_10 = arith.constant 0 : index
    %12 = vector.load %arg5[%c0_9, %c0_10] : memref<1x256xf32, #tpu.memory_space<vmem>>, vector<1x256xf32>
    %13 = vector.broadcast %12 : vector<1x256xf32> to vector<128x256xf32>
    %14 = arith.addf %11, %13 : vector<128x256xf32>
    %cst_11 = arith.constant 0.000000e+00 : f32
    %15 = vector.broadcast %cst_11 : f32 to vector<128x256xf32>
    %16 = arith.maximumf %14, %15 : vector<128x256xf32>
    %17 = arith.truncf %16 : vector<128x256xf32> to vector<128x256xbf16>
    %c0_12 = arith.constant 0 : index
    %c0_13 = arith.constant 0 : index
    %18 = vector.load %arg6[%c0_12, %c0_13] : memref<256x4xbf16, #tpu.memory_space<vmem>>, vector<256x4xbf16>
    %cst_14 = arith.constant dense<0.000000e+00> : vector<128x4xf32>
    %19 = tpu.matmul %17, %18, %cst_14 {dimension_numbers = #tpu.dot_dimension_numbers<[1], [0], [0], [1], [0, 0, 1, 1], [], []>} : vector<128x256xbf16>, vector<256x4xbf16>, vector<128x4xf32> -> vector<128x4xf32>
    %c0_15 = arith.constant 0 : index
    %c0_16 = arith.constant 0 : index
    %20 = vector.load %arg7[%c0_15, %c0_16] : memref<1x4xf32, #tpu.memory_space<vmem>>, vector<1x4xf32>
    %21 = vector.broadcast %20 : vector<1x4xf32> to vector<128x4xf32>
    %22 = arith.addf %19, %21 : vector<128x4xf32>
    %c0_17 = arith.constant 0 : index
    %c0_18 = arith.constant 0 : index
    %23 = vector.load %arg8[%c0_17, %c0_18] : memref<128x4xf32, #tpu.memory_space<vmem>>, vector<128x4xf32>
    tpu.vector_store %arg8[%c0_17, %c0_18], %22 {strides = array<i32>} : memref<128x4xf32, #tpu.memory_space<vmem>>, vector<128x4xf32>,
    return
  }
  func.func @transform_0(%arg0: i32) -> (i32, i32) {
    %c0_i32 = arith.constant 0 : i32
    %c0_i32_0 = arith.constant 0 : i32
    return %arg0, %c0_i32 : i32, i32
  }
  func.func @transform_1(%arg0: i32) -> (i32, i32) {
    %c0_i32 = arith.constant 0 : i32
    %c0_i32_0 = arith.constant 0 : i32
    %c0_i32_1 = arith.constant 0 : i32
    return %c0_i32, %c0_i32_0 : i32, i32
  }
  func.func @transform_2(%arg0: i32) -> (i32, i32) {
    %c0_i32 = arith.constant 0 : i32
    %c0_i32_0 = arith.constant 0 : i32
    %c0_i32_1 = arith.constant 0 : i32
    return %c0_i32, %c0_i32_0 : i32, i32
  }
  func.func @transform_3(%arg0: i32) -> (i32, i32) {
    %c0_i32 = arith.constant 0 : i32
    %c0_i32_0 = arith.constant 0 : i32
    %c0_i32_1 = arith.constant 0 : i32
    return %c0_i32, %c0_i32_0 : i32, i32
  }
  func.func @transform_4(%arg0: i32) -> (i32, i32) {
    %c0_i32 = arith.constant 0 : i32
    %c0_i32_0 = arith.constant 0 : i32
    %c0_i32_1 = arith.constant 0 : i32
    return %c0_i32, %c0_i32_0 : i32, i32
  }
  func.func @transform_5(%arg0: i32) -> (i32, i32) {
    %c0_i32 = arith.constant 0 : i32
    %c0_i32_0 = arith.constant 0 : i32
    %c0_i32_1 = arith.constant 0 : i32
    return %c0_i32, %c0_i32_0 : i32, i32
  }
  func.func @transform_6(%arg0: i32) -> (i32, i32) {
    %c0_i32 = arith.constant 0 : i32
    %c0_i32_0 = arith.constant 0 : i32
    %c0_i32_1 = arith.constant 0 : i32
    return %c0_i32, %c0_i32_0 : i32, i32
  }
  func.func @transform_7(%arg0: i32) -> (i32, i32) {
    %c0_i32 = arith.constant 0 : i32
    %c0_i32_0 = arith.constant 0 : i32
    return %arg0, %c0_i32 : i32, i32
  }
}

</mosaic_0001>

<bundles_post_ra>
// kernel: dqn_forward.1
= control target key start
LH: loop header
LB: loop body
LE: loop exit
PB: predicated region body
PF: predicated region fallthrough
CT: control target
= control target key end

     0   :  { %s1712_s24 = smov 0   ;;  %s1714_s25 = smov 0   ;;  %s2083_s0 = inlined_call_operand.vmem [shape: f32[200,32], index: 0, kind: input, shape index: {}]   ;;  %s2084_s1 = inlined_call_operand.vmem [shape: bf16[32,128], index: 1, kind: input, shape index: {}]   ;;  %s2085_s2 = inlined_call_operand.vmem [shape: f32[1,128], index: 2, kind: input, shape index: {}]   ;;  %s2086_s3 = inlined_call_operand.vmem [shape: bf16[128,256], index: 3, kind: input, shape index: {}]   ;;  %s2087_s4 = inlined_call_operand.vmem [shape: f32[1,256], index: 4, kind: input, shape index: {}]   ;;  %s2088_s5 = inlined_call_operand.vmem [shape: bf16[256,4], index: 5, kind: input, shape index: {}]   ;;  %s2089_s6 = inlined_call_operand.vmem [shape: f32[1,4], index: 6, kind: input, shape index: {}]   ;;  %s2090_s7 = inlined_call_operand.vmem [shape: f32[200,4], index: 7, kind: output, shape index: {}]  }
   0x1   :  { %s1716_s26 = smov 0  }
   0x2 LB: > { %s1725_s27 = sadd.s32 4294967295, %s1637_s26   ;;  %s1727_s28 = sadd.s32 1, %s1637_s26   ;;  %s1637_s26 = sphi %s1716_s26, %s2097_s26   ;;  %s1633_s25 = sphi %s1714_s25, %s2096_s25   ;;  %s1629_s24 = sphi %s1712_s24, %s2095_s24  }
   0x3   : > { %s173_s29 = ssub.s32 %s1637_s26, %s1727_s28  ;;  %s176_s30 = sadd.s32 1, %s1633_s25 }
   0x4   : > { %p174_p0 = scmp.eq.s32.totalorder %s173_s29, 0  ;;  %p186_p1 = scmp.ne.s32.totalorder %s1633_s25, %s1629_s24 }
   0x5   : > { %p187_p2 = scmp.eq.s32.totalorder %s1725_s27, 1  ;;  %p1290_p3 = scmp.ge.s32.totalorder %s1637_s26, 1 }
   0x6   : > { %s1735_s8 = scalar_select %p174_p0, %s1633_s25, %s176_s30  }
   0x7   : > { %p1737_p4 = por %p187_p2, %p186_p1  ;;  %p246_p5 = scmp.lt.s32.totalorder %s1637_s26, 3 }
   0x9   : > { %p247_p6 = pnand %p1290_p3, %p246_p5 }
   0xa   : > { %v1541_v0 = vld [vmem:[%s2084_s1] sm:$0xff] (!%p247_p6)   ;;  %s1745_s12 = sshll.u32 (!%p247_p6), %s1725_s27, 4  ;;  %v1542_v1 = vld [vmem:[%s2084_s1 + $0x8] sm:$0xff] (!%p247_p6)   ;;  %v1546_v4 = vld [vmem:[%s2086_s3 + $0x14] ss:$8 sps:$4 sm:$0xff] (!%p247_p6)   ;;  %vm348_vm0 = vcmask (!%p247_p6), 261120  }
   0xb   : > { %250 = sbr.rel (%p247_p6) target bundleno = 794 (0x31a), region = 48  ;;  %p286_p7 = scmp.lt.s32.totalorder (!%p247_p6), %s1745_s12, 24  ;;  %1432 = vmatprep.subr.bf16.mxu0 (!%p247_p6), %v1541_v0  ;;  %v1543_v2 = vld [vmem:[%s2086_s3 + $0x4] ss:$8 sps:$4 sm:$0xff] (!%p247_p6)   ;;  %v1545_v3 = vld [vmem:[%s2086_s3] ss:$8 sps:$4 sm:$0xff] (!%p247_p6)  }
   0xc   : > { %1433 = vmatpush3.bf16.msra.mxu0 (!%p247_p6), %v1541_v0  ;;  %602 = vmatprep.subr.bf16.mxu1 (!%p247_p6), %v1543_v2  ;;  %v1548_v5 = vld [vmem:[%s2086_s3 + $0x10] ss:$8 sps:$4 sm:$0xff] (!%p247_p6)   ;;  %v1549_v6 = vld [vmem:[%s2086_s3 + $0x24] ss:$8 sps:$4 sm:$0xff] (!%p247_p6)   ;;  %v1551_v16 = vld [vmem:[%s2086_s3 + $0x20] ss:$8 sps:$4 sm:$0xff] (!%p247_p6)  }
   0xd   : > { %1434 = vmatprep.subr.bf16.mxu0 (!%p247_p6), %v1542_v1  ;;  %603 = vmatpush1.bf16.msra.mxu1 (!%p247_p6), %v1545_v3  ;;  %v1552_v17 = vld [vmem:[%s2086_s3 + $0x34] ss:$8 sps:$4 sm:$0xff] (!%p247_p6)   ;;  %v1554_v22 = vld [vmem:[%s2086_s3 + $0x30] ss:$8 sps:$4 sm:$0xff] (!%p247_p6)   ;;  %v1555_v23 = vld [vmem:[%s2086_s3 + $0x44] ss:$8 sps:$4 sm:$0xff] (!%p247_p6)  }
   0xe   : > { %604 = vmatprep.subr.bf16.mxu1 (!%p247_p6), %v1546_v4  ;;  %v1557_v25 = vld [vmem:[%s2086_s3 + $0x40] ss:$8 sps:$4 sm:$0xff] (!%p247_p6)   ;;  %v1558_v27 = vld [vmem:[%s2086_s3 + $0x54] ss:$8 sps:$4 sm:$0xff] (!%p247_p6)   ;;  %v1560_v32 = vld [vmem:[%s2086_s3 + $0x50] ss:$8 sps:$4 sm:$0xff] (!%p247_p6)  }
   0xf   : > { %v1561_v38 = vld [vmem:[%s2086_s3 + $0x64] ss:$8 sps:$4 sm:$0xff] (!%p247_p6)   ;;  %v1563_v39 = vld [vmem:[%s2086_s3 + $0x60] ss:$8 sps:$4 sm:$0xff] (!%p247_p6)   ;;  %v1564_v40 = vld [vmem:[%s2086_s3 + $0x74] ss:$8 sps:$4 sm:$0xff] (!%p247_p6)  }
  0x10   : > { %1435 = vmatpush3.bf16.msra.mxu0 (!%p247_p6), %v1542_v1  ;;  %v1566_v41 = vld [vmem:[%s2086_s3 + $0x70] ss:$8 sps:$4 sm:$0xff] (!%p247_p6)   ;;  %v1671_v42 = vmov (!%p247_p6), 0   ;;  %v1567_v43 = vld [vmem:[%s2088_s5 + $0x40] sm:$0xff] (!%p247_p6)   ;;  %v1569_v45 = vld [vmem:[%s2088_s5 + $0x48] sm:$0xff] (!%p247_p6)   ;;  %s278_s26 = sand.u32 (!%p247_p6), 1, %s1629_s24  }
  0x11   : > { %605 = vmatpush1.bf16.msra.mxu1 (!%p247_p6), %v1548_v5  ;;  %634 = vmatprep.mubr.bf16.mxu1 (!%p247_p6), %v1671_v42  ;;  %v1568_v44 = vld [vmem:[%s2088_s5] sm:$0xff] (!%p247_p6)   ;;  %v1570_v46 = vld [vmem:[%s2088_s5 + $0x8] sm:$0xff] (!%p247_p6)   ;;  %v1571_v47 = vld [vmem:[%s2088_s5 + $0x50] sm:$0xff] (!%p247_p6)   ;;  %s1291_s29 = sshll.u32 (!%p247_p6), %s278_s26, 7  ;;  %vm995_vm1 = vcmask (!%p247_p6), 31744  }
  0x12   : > { %s287_s17 = scalar_select %p286_p7, %s1745_s12, 24  ;;  %606 = vmatprep.subr.bf16.mxu1 %v1549_v6  ;;  %1368 = vmatprep.subr.bf16.mxu0 %v1567_v43  ;;  %v1572_v48 = vld [vmem:[%s2088_s5 + $0x10] sm:$0xff]   ;;  %v1573_v49 = vld [vmem:[%s2088_s5 + $0x58] sm:$0xff]   ;;  %v1575_v51 = vld [vmem:[%s2088_s5 + $0x60] sm:$0xff]  }
  0x13   : > { %v1574_v50 = vld [vmem:[%s2088_s5 + $0x18] sm:$0xff]   ;;  %v1576_v52 = vld [vmem:[%s2088_s5 + $0x20] sm:$0xff]   ;;  %v1577_v53 = vld [vmem:[%s2088_s5 + $0x68] sm:$0xff]   ;;  %s1934_s13 = scalar_lea.vmem [#allocation2], %s1291_s29   ;;  %s1020_s24 = ssub.s32 (%p1737_p4), 25, %s1745_s12 }
  0x14   : > { %s1293_s22 = sshll.u32 %s287_s17, 3  ;;  %v1578_v54 = vld [vmem:[%s2088_s5 + $0x28] sm:$0xff]   ;;  %v1294_v55 = vld [vmem:[%s2085_s2] ss:$0 sm:$0xff]  ;;  %s1355_s14 = sshll.u32 (%p1737_p4), %s1725_s27, 7 }
  0x15   : > { %s1767_s10 = scalar_lea.vmem %s2083_s0, %s1293_s22  ;;  %607 = vmatpush1.bf16.msra.mxu1 %v1551_v16  ;;  %p1021_p8 = scmp.lt.s32.totalorder (%p1737_p4), %s1020_s24, 16 }
  0x16   : > { %v301_v7 = vld [vmem:[%s1767_s10] sm:$0xff]  ;;  %v302_v8 = vld [vmem:[%s1767_s10 + $0x8] sm:$0xff]  ;;  %v303_v9 = vld [vmem:[%s1767_s10 + $0x10] sm:$0xff]  ;;  %608 = vmatprep.subr.bf16.mxu1 %v1552_v17  ;;  %s1990_s17 = scalar_lea.vmem (%p1737_p4), %s2090_s7, %s1355_s14  }
  0x17   : > { %v317_v10 = vpack.c.bf16 %v302_v8, %v301_v7  ;;  %v304_v11 = vld [vmem:[%s1767_s10 + $0x18] sm:$0xff]  ;;  %v305_v12 = vld [vmem:[%s1767_s10 + $0x20] sm:$0xff]  ;;  %v306_v13 = vld [vmem:[%s1767_s10 + $0x28] sm:$0xff] }
  0x18   : > { %v318_v14 = vpack.c.bf16 %v304_v11, %v303_v9  ;;  %v319_v15 = vpack.c.bf16 %v306_v13, %v305_v12  ;;  %v307_v18 = vld [vmem:[%s1767_s10 + $0x30] sm:$0xff]  ;;  %v308_v19 = vld [vmem:[%s1767_s10 + $0x38] sm:$0xff]  ;;  %v309_v20 = vld [vmem:[%s1767_s10 + $0x40] sm:$0xff] }
  0x19   : > { %1436 = vmatprep.mubr.msk.bf16.mxu0 %vm348_vm0, %v317_v10  ;;  %v310_v21 = vld [vmem:[%s1767_s10 + $0x48] sm:$0xff]  ;;  %v320_v24 = vpack.c.bf16 %v308_v19, %v307_v18  ;;  %609 = vmatpush1.bf16.msra.mxu1 %v1554_v22  ;;  %v311_v28 = vld [vmem:[%s1767_s10 + $0x50] sm:$0xff]  ;;  %v312_v29 = vld [vmem:[%s1767_s10 + $0x58] sm:$0xff] }
  0x1a   : > { %1437 = vmatmul.mubr.msk.bf16.vlgmr.msra.gmra.mrb[0].mxu0 %vm348_vm0, %v318_v14  ;;  %v321_v26 = vpack.c.bf16 %v310_v21, %v309_v20  ;;  %610 = vmatprep.subr.bf16.mxu1 %v1555_v23  ;;  %v313_v30 = vld [vmem:[%s1767_s10 + $0x60] sm:$0xff]  ;;  %v314_v31 = vld [vmem:[%s1767_s10 + $0x68] sm:$0xff]  ;;  %v322_v33 = vpack.c.bf16 %v312_v29, %v311_v28  ;;  %v315_v35 = vld [vmem:[%s1767_s10 + $0x70] sm:$0xff] }
  0x1b   : > { %1440 = vmatprep.mubr.msk.bf16.mxu0 %vm348_vm0, %v319_v15  ;;  %v323_v34 = vpack.c.bf16 %v314_v31, %v313_v30  ;;  %v316_v36 = vld [vmem:[%s1767_s10 + $0x78] sm:$0xff]  ;;  %1369 = vmatpush3.bf16.msra.mxu0 %v1568_v44 }
  0x1c   : > { %v324_v37 = vpack.c.bf16 %v316_v36, %v315_v35  ;;  %1370 = vmatprep.subr.bf16.mxu0 %v1569_v45 }
  0x1d   : > { %611 = vmatpush1.bf16.msra.mxu1 %v1557_v25 }
  0x1e   : > { %612 = vmatprep.subr.bf16.mxu1 %v1558_v27 }
  0x1f   : > { %1371 = vmatpush3.bf16.msra.mxu0 %v1570_v46 }
  0x20   : > { %1372 = vmatprep.subr.bf16.mxu0 %v1571_v47 }
  0x21   : > { %613 = vmatpush1.bf16.msra.mxu1 %v1560_v32 }
  0x22   : > { %1441 = vmatmul.mubr.msk.bf16.gmra.mrb[4].mxu0 %vm348_vm0, %v320_v24  ;;  %614 = vmatprep.subr.bf16.mxu1 %v1561_v38 }
  0x23   : > { %1444 = vmatprep.mubr.msk.bf16.mxu0 %vm348_vm0, %v321_v26  ;;  %1373 = vmatpush3.bf16.msra.mxu0 %v1572_v48 }
  0x24   : > { %1374 = vmatprep.subr.bf16.mxu0 %v1573_v49  ;;  %v1579_v49 = vld [vmem:[%s2088_s5 + $0x70] sm:$0xff]  }
  0x25   : > { %615 = vmatpush1.bf16.msra.mxu1 %v1563_v39 }
  0x26   : > { %616 = vmatprep.subr.bf16.mxu1 %v1564_v40 }
  0x27   : > { %1375 = vmatpush3.bf16.msra.mxu0 %v1574_v50  ;;  %v1580_v50 = vld [vmem:[%s2088_s5 + $0x30] sm:$0xff]  }
  0x28   : > { %1376 = vmatprep.subr.bf16.mxu0 %v1575_v51  ;;  %v1581_v51 = vld [vmem:[%s2088_s5 + $0x78] sm:$0xff]  }
  0x29   : > { %617 = vmatpush1.bf16.msra.mxu1 %v1566_v41 }
  0x2a   : > { %1445 = vmatmul.mubr.msk.bf16.gmra.mrb[8].mxu0 %vm348_vm0, %v322_v33 }
  0x2b   : > { %1448 = vmatprep.mubr.msk.bf16.mxu0 %vm348_vm0, %v323_v34  ;;  %1377 = vmatpush3.bf16.msra.mxu0 %v1576_v52  ;;  %v1582_v52 = vld [vmem:[%s2088_s5 + $0x38] sm:$0xff]  }
  0x2c   : > { %1378 = vmatprep.subr.bf16.mxu0 %v1577_v53 }
  0x2f   : > { %1379 = vmatpush3.bf16.msra.mxu0 %v1578_v54 }
  0x30   : > { %1380 = vmatprep.subr.bf16.mxu0 %v1579_v49 }
  0x32   : > { %1449 = vmatmul.mubr.msk.bf16.gmra.mrb[12].mxu0 %vm348_vm0, %v324_v37 }
  0x33   : > { %1381 = vmatpush3.bf16.msra.mxu0 %v1580_v50 }
  0x34   : > { %1382 = vmatprep.subr.bf16.mxu0 %v1581_v51 }
  0x37   : > { %1383 = vmatpush3.bf16.msra.mxu0 %v1582_v52 }
  0xed   : > { %v1438_v56 = vpop.f32.mrb[0].mxu0 }
  0xee   : > { %v416_v57 = vadd.f32 %v1438_v56, %v1294_v55  ;;  %v407_v58 = vpop.f32.mrb[1].mxu0 }
  0xef   : > { %v408_v59 = vadd.f32 %v1294_v55, %v407_v58  ;;  %v1439_v60 = vpop.f32.mrb[2].mxu0 }
  0xf0   : > { %v419_v61 = vadd.f32 %v1439_v60, %v1294_v55  ;;  %v410_v62 = vpop.f32.mrb[3].mxu0  ;;  %v472_v0 = vmax.f32 %v416_v57, 0.0 }
  0xf1   : > { %v411_v63 = vadd.f32 %v1294_v55, %v410_v62  ;;  %v470_v2 = vmax.f32 %v408_v59, 0.0 }
  0xf2   : > { %v473_v1 = vmax.f32 %v419_v61, 0.0 }
  0xf3   : > { %v471_v3 = vmax.f32 %v411_v63, 0.0 }
  0xf4   : > { %v487_v4 = vpack.c.bf16 %v473_v1, %v472_v0 }
  0xf5   : > { %v486_v5 = vpack.c.bf16 %v471_v3, %v470_v2  ;;  %v1442_v6 = vpop.f32.mrb[4].mxu0 }
  0xf6   : > { %v432_v7 = vadd.f32 %v1442_v6, %v1294_v55  ;;  %v423_v8 = vpop.f32.mrb[5].mxu0 }
  0xf7   : > { %635 = vmatmul.mubr.bf16.vlgmr.msra.gmra.mrb[0].mxu1 %v486_v5  ;;  %v424_v9 = vadd.f32 %v1294_v55, %v423_v8  ;;  %v1443_v10 = vpop.f32.mrb[6].mxu0 }
  0xf8   : > { %v476_v11 = vmax.f32 %v432_v7, 0.0  ;;  %v435_v12 = vadd.f32 %v1443_v10, %v1294_v55  ;;  %v426_v13 = vpop.f32.mrb[7].mxu0  ;;  %644 = vmatprep.mubr.bf16.mxu1 %v1671_v42 }
  0xf9   : > { %v474_v14 = vmax.f32 %v424_v9, 0.0  ;;  %v427_v15 = vadd.f32 %v1294_v55, %v426_v13 }
  0xfa   : > { %v477_v16 = vmax.f32 %v435_v12, 0.0 }
  0xfb   : > { %v475_v17 = vmax.f32 %v427_v15, 0.0 }
  0xfc   : > { %v489_v18 = vpack.c.bf16 %v477_v16, %v476_v11 }
  0xfd   : > { %v488_v19 = vpack.c.bf16 %v475_v17, %v474_v14  ;;  %v1446_v20 = vpop.f32.mrb[8].mxu0 }
  0xfe   : > { %v448_v21 = vadd.f32 %v1446_v20, %v1294_v55  ;;  %v439_v22 = vpop.f32.mrb[9].mxu0 }
  0xff   : > { %645 = vmatmul.mubr.bf16.gmra.mrb[4].mxu1 %v487_v4  ;;  %v440_v23 = vadd.f32 %v1294_v55, %v439_v22  ;;  %v1447_v24 = vpop.f32.mrb[10].mxu0 }
 0x100   : > { %654 = vmatprep.mubr.bf16.mxu1 %v1671_v42  ;;  %v480_v25 = vmax.f32 %v448_v21, 0.0  ;;  %v451_v26 = vadd.f32 %v1447_v24, %v1294_v55  ;;  %v442_v27 = vpop.f32.mrb[11].mxu0 }
 0x101   : > { %v478_v28 = vmax.f32 %v440_v23, 0.0  ;;  %v443_v29 = vadd.f32 %v1294_v55, %v442_v27 }
 0x102   : > { %v481_v30 = vmax.f32 %v451_v26, 0.0 }
 0x103   : > { %v479_v31 = vmax.f32 %v443_v29, 0.0 }
 0x104   : > { %v491_v32 = vpack.c.bf16 %v481_v30, %v480_v25 }
 0x105   : > { %v490_v33 = vpack.c.bf16 %v479_v31, %v478_v28  ;;  %v1450_v34 = vpop.f32.mrb[12].mxu0 }
 0x106   : > { %v464_v35 = vadd.f32 %v1450_v34, %v1294_v55  ;;  %v455_v36 = vpop.f32.mrb[13].mxu0 }
 0x107   : > { %655 = vmatmul.mubr.bf16.gmra.mrb[8].mxu1 %v488_v19  ;;  %v456_v37 = vadd.f32 %v1294_v55, %v455_v36  ;;  %v1451_v38 = vpop.f32.mrb[14].mxu0 }
 0x108   : > { %664 = vmatprep.mubr.bf16.mxu1 %v1671_v42  ;;  %v484_v39 = vmax.f32 %v464_v35, 0.0  ;;  %v467_v40 = vadd.f32 %v1451_v38, %v1294_v55  ;;  %v458_v41 = vpop.f32.mrb[15].mxu0 }
 0x109   : > { %v482_v43 = vmax.f32 %v456_v37, 0.0  ;;  %v459_v44 = vadd.f32 %v1294_v55, %v458_v41  ;;  %v510_v55 = vld [vmem:[%s2087_s4] sm:$0x3] }
 0x10a   : > { %v485_v45 = vmax.f32 %v467_v40, 0.0 }
 0x10b   : > { %v483_v46 = vmax.f32 %v459_v44, 0.0 }
 0x10c   : > { %v493_v47 = vpack.c.bf16 %v485_v45, %v484_v39 }
 0x10d   : > { %v492_v48 = vpack.c.bf16 %v483_v46, %v482_v43 }
 0x10f   : > { %665 = vmatmul.mubr.bf16.gmra.mrb[12].mxu1 %v489_v18 }
 0x110   : > { %674 = vmatprep.mubr.bf16.mxu1 %v1671_v42 }
 0x117   : > { %675 = vmatmul.mubr.bf16.gmra.mrb[16].mxu1 %v490_v33 }
 0x118   : > { %684 = vmatprep.mubr.bf16.mxu1 %v1671_v42 }
 0x11f   : > { %685 = vmatmul.mubr.bf16.gmra.mrb[20].mxu1 %v491_v32 }
 0x120   : > { %694 = vmatprep.mubr.bf16.mxu1 %v1671_v42 }
 0x127   : > { %695 = vmatmul.mubr.bf16.gmra.mrb[24].mxu1 %v492_v48 }
 0x128   : > { %704 = vmatprep.mubr.bf16.mxu1 %v1671_v42  ;;  %v512_v42 = vlaneseq }
 0x12a   : > { %v513_v53 = vshrl.u32 %v512_v42, 7 }
 0x12c   : > { %v514_v54 = vsub.s32 0, %v513_v53  ;;  %v518_v56 = vsub.s32 1, %v513_v53 }
 0x12e   : > { %v1891_v57 = vrot.slane %v510_v55, %v514_v54  ;;  %v1893_v58 = vrot.slane %v510_v55, %v518_v56 }
 0x12f   : > { %705 = vmatmul.mubr.bf16.gmra.mrb[28].mxu1 %v493_v47 }
 0x1ca   : > { %v636_v59 = vpop.f32.mrb[0].mxu1 }
 0x1cb   : > { %v637_v60 = vadd.f32 %v636_v59, %v1891_v57  ;;  %v638_v61 = vpop.f32.mrb[1].mxu1 }
 0x1cc   : > { %v639_v62 = vadd.f32 %v638_v61, %v1893_v58  ;;  %v640_v63 = vpop.f32.mrb[2].mxu1 }
 0x1cd   : > { %v641_v0 = vadd.f32 %v640_v63, %v1891_v57  ;;  %v642_v1 = vpop.f32.mrb[3].mxu1  ;;  %v715_v3 = vmax.f32 %v637_v60, 0.0 }
 0x1ce   : > { %v643_v2 = vadd.f32 %v642_v1, %v1893_v58  ;;  %v716_v5 = vmax.f32 %v639_v62, 0.0 }
 0x1cf   : > { %v717_v4 = vmax.f32 %v641_v0, 0.0 }
 0x1d0   : > { %v718_v6 = vmax.f32 %v643_v2, 0.0 }
 0x1d1   : > { %v747_v7 = vpack.c.bf16 %v717_v4, %v715_v3 }
 0x1d2   : > { %v748_v8 = vpack.c.bf16 %v718_v6, %v716_v5  ;;  %v646_v9 = vpop.f32.mrb[4].mxu1 }
 0x1d3   : > { %v647_v10 = vadd.f32 %v646_v9, %v1891_v57  ;;  %v648_v11 = vpop.f32.mrb[5].mxu1 }
 0x1d4   : > { %v649_v12 = vadd.f32 %v648_v11, %v1893_v58  ;;  %v650_v13 = vpop.f32.mrb[6].mxu1  ;;  %930 = vmatprep.mubr.bf16.mxu0 %v748_v8 }
 0x1d5   : > { %v651_v14 = vadd.f32 %v650_v13, %v1891_v57  ;;  %v652_v15 = vpop.f32.mrb[7].mxu1  ;;  %931 = vmatmul.mubr.bf16.vlgmr.msra.gmra.mrb[16].mxu0 %v747_v7  ;;  %v719_v17 = vmax.f32 %v647_v10, 0.0 }
 0x1d6   : > { %v653_v16 = vadd.f32 %v652_v15, %v1893_v58  ;;  %v720_v19 = vmax.f32 %v649_v12, 0.0 }
 0x1d7   : > { %v721_v18 = vmax.f32 %v651_v14, 0.0 }
 0x1d8   : > { %v722_v20 = vmax.f32 %v653_v16, 0.0 }
 0x1d9   : > { %v749_v21 = vpack.c.bf16 %v721_v18, %v719_v17 }
 0x1da   : > { %v750_v22 = vpack.c.bf16 %v722_v20, %v720_v19  ;;  %v656_v23 = vpop.f32.mrb[8].mxu1 }
 0x1db   : > { %v657_v24 = vadd.f32 %v656_v23, %v1891_v57  ;;  %v658_v25 = vpop.f32.mrb[9].mxu1 }
 0x1dc   : > { %v659_v26 = vadd.f32 %v658_v25, %v1893_v58  ;;  %v660_v27 = vpop.f32.mrb[10].mxu1  ;;  %938 = vmatprep.mubr.bf16.mxu0 %v750_v22 }
 0x1dd   : > { %v661_v28 = vadd.f32 %v660_v27, %v1891_v57  ;;  %v662_v29 = vpop.f32.mrb[11].mxu1  ;;  %939 = vmatmul.mubr.bf16.gmra.mrb[20].mxu0 %v749_v21  ;;  %v723_v31 = vmax.f32 %v657_v24, 0.0 }
 0x1de   : > { %v663_v30 = vadd.f32 %v662_v29, %v1893_v58  ;;  %v724_v33 = vmax.f32 %v659_v26, 0.0 }
 0x1df   : > { %v725_v32 = vmax.f32 %v661_v28, 0.0 }
 0x1e0   : > { %v726_v34 = vmax.f32 %v663_v30, 0.0 }
 0x1e1   : > { %v751_v35 = vpack.c.bf16 %v725_v32, %v723_v31 }
 0x1e2   : > { %v752_v36 = vpack.c.bf16 %v726_v34, %v724_v33  ;;  %v666_v37 = vpop.f32.mrb[12].mxu1 }
 0x1e3   : > { %v667_v38 = vadd.f32 %v666_v37, %v1891_v57  ;;  %v668_v39 = vpop.f32.mrb[13].mxu1 }
 0x1e4   : > { %v669_v40 = vadd.f32 %v668_v39, %v1893_v58  ;;  %v670_v41 = vpop.f32.mrb[14].mxu1  ;;  %946 = vmatprep.mubr.bf16.mxu0 %v752_v36 }
 0x1e5   : > { %v671_v43 = vadd.f32 %v670_v41, %v1891_v57  ;;  %v672_v44 = vpop.f32.mrb[15].mxu1  ;;  %947 = vmatmul.mubr.bf16.gmra.mrb[24].mxu0 %v751_v35  ;;  %v727_v46 = vmax.f32 %v667_v38, 0.0 }
 0x1e6   : > { %v673_v45 = vadd.f32 %v672_v44, %v1893_v58  ;;  %v728_v48 = vmax.f32 %v669_v40, 0.0 }
 0x1e7   : > { %v729_v47 = vmax.f32 %v671_v43, 0.0 }
 0x1e8   : > { %v730_v49 = vmax.f32 %v673_v45, 0.0 }
 0x1e9   : > { %v753_v50 = vpack.c.bf16 %v729_v47, %v727_v46  ;;  %v1931_v47 = vld [vmem:[%s2089_s6] ss:$0 sm:$0xff] }
 0x1ea   : > { %v754_v51 = vpack.c.bf16 %v730_v49, %v728_v48  ;;  %v676_v52 = vpop.f32.mrb[16].mxu1 }
 0x1eb   : > { %v677_v42 = vadd.f32 %v676_v52, %v1891_v57  ;;  %v678_v53 = vpop.f32.mrb[17].mxu1 }
 0x1ec   : > { %v679_v54 = vadd.f32 %v678_v53, %v1893_v58  ;;  %v680_v55 = vpop.f32.mrb[18].mxu1  ;;  %954 = vmatprep.mubr.bf16.mxu0 %v754_v51 }
 0x1ed   : > { %v681_v56 = vadd.f32 %v680_v55, %v1891_v57  ;;  %v682_v59 = vpop.f32.mrb[19].mxu1  ;;  %955 = vmatmul.mubr.bf16.gmra.mrb[28].mxu0 %v753_v50  ;;  %v731_v61 = vmax.f32 %v677_v42, 0.0 }
 0x1ee   : > { %v683_v60 = vadd.f32 %v682_v59, %v1893_v58  ;;  %v732_v63 = vmax.f32 %v679_v54, 0.0 }
 0x1ef   : > { %v733_v62 = vmax.f32 %v681_v56, 0.0 }
 0x1f0   : > { %v734_v0 = vmax.f32 %v683_v60, 0.0 }
 0x1f1   : > { %v755_v1 = vpack.c.bf16 %v733_v62, %v731_v61 }
 0x1f2   : > { %v756_v2 = vpack.c.bf16 %v734_v0, %v732_v63  ;;  %v686_v3 = vpop.f32.mrb[20].mxu1 }
 0x1f3   : > { %v687_v4 = vadd.f32 %v686_v3, %v1891_v57  ;;  %v688_v5 = vpop.f32.mrb[21].mxu1 }
 0x1f4   : > { %v689_v6 = vadd.f32 %v688_v5, %v1893_v58  ;;  %v690_v7 = vpop.f32.mrb[22].mxu1  ;;  %962 = vmatprep.mubr.bf16.mxu0 %v756_v2 }
 0x1f5   : > { %v691_v8 = vadd.f32 %v690_v7, %v1891_v57  ;;  %v692_v9 = vpop.f32.mrb[23].mxu1  ;;  %963 = vmatmul.mubr.bf16.gmra.mrb[32].mxu0 %v755_v1  ;;  %v735_v11 = vmax.f32 %v687_v4, 0.0 }
 0x1f6   : > { %v693_v10 = vadd.f32 %v692_v9, %v1893_v58  ;;  %v736_v13 = vmax.f32 %v689_v6, 0.0 }
 0x1f7   : > { %v737_v12 = vmax.f32 %v691_v8, 0.0 }
 0x1f8   : > { %v738_v14 = vmax.f32 %v693_v10, 0.0 }
 0x1f9   : > { %v757_v15 = vpack.c.bf16 %v737_v12, %v735_v11 }
 0x1fa   : > { %v758_v16 = vpack.c.bf16 %v738_v14, %v736_v13  ;;  %v696_v17 = vpop.f32.mrb[24].mxu1 }
 0x1fb   : > { %v697_v18 = vadd.f32 %v696_v17, %v1891_v57  ;;  %v698_v19 = vpop.f32.mrb[25].mxu1 }
 0x1fc   : > { %v699_v20 = vadd.f32 %v698_v19, %v1893_v58  ;;  %v700_v21 = vpop.f32.mrb[26].mxu1  ;;  %970 = vmatprep.mubr.bf16.mxu0 %v758_v16 }
 0x1fd   : > { %v701_v22 = vadd.f32 %v700_v21, %v1891_v57  ;;  %v702_v23 = vpop.f32.mrb[27].mxu1  ;;  %971 = vmatmul.mubr.bf16.gmra.mrb[36].mxu0 %v757_v15  ;;  %v739_v25 = vmax.f32 %v697_v18, 0.0 }
 0x1fe   : > { %v703_v24 = vadd.f32 %v702_v23, %v1893_v58  ;;  %v740_v27 = vmax.f32 %v699_v20, 0.0 }
 0x1ff   : > { %v741_v26 = vmax.f32 %v701_v22, 0.0 }
 0x200   : > { %v742_v28 = vmax.f32 %v703_v24, 0.0 }
 0x201   : > { %v759_v29 = vpack.c.bf16 %v741_v26, %v739_v25 }
 0x202   : > { %v760_v30 = vpack.c.bf16 %v742_v28, %v740_v27  ;;  %v706_v31 = vpop.f32.mrb[28].mxu1 }
 0x203   : > { %v707_v32 = vadd.f32 %v706_v31, %v1891_v57  ;;  %v708_v33 = vpop.f32.mrb[29].mxu1 }
 0x204   : > { %v709_v34 = vadd.f32 %v708_v33, %v1893_v58  ;;  %v710_v35 = vpop.f32.mrb[30].mxu1  ;;  %978 = vmatprep.mubr.bf16.mxu0 %v760_v30 }
 0x205   : > { %v711_v36 = vadd.f32 %v710_v35, %v1891_v57  ;;  %v712_v37 = vpop.f32.mrb[31].mxu1  ;;  %979 = vmatmul.mubr.bf16.gmra.mrb[40].mxu0 %v759_v29  ;;  %v743_v39 = vmax.f32 %v707_v32, 0.0 }
 0x206   : > { %v713_v38 = vadd.f32 %v712_v37, %v1893_v58  ;;  %v744_v41 = vmax.f32 %v709_v34, 0.0 }
 0x207   : > { %v745_v40 = vmax.f32 %v711_v36, 0.0 }
 0x208   : > { %v746_v43 = vmax.f32 %v713_v38, 0.0 }
 0x209   : > { %v761_v44 = vpack.c.bf16 %v745_v40, %v743_v39 }
 0x20a   : > { %v762_v45 = vpack.c.bf16 %v746_v43, %v744_v41 }
 0x20c   : > { %986 = vmatprep.mubr.bf16.mxu0 %v762_v45 }
 0x20d   : > { %987 = vmatmul.mubr.bf16.gmra.mrb[44].mxu0 %v761_v44 }
 0x2a8   : > { %v1384_v46 = vpop.f32.mrb[16].mxu0 }
 0x2a9   : > { %v1385_v57 = vpop.f32.mrb[17].mxu0 }
 0x2aa   : > { %v1386_v48 = vadd.f32 %v1385_v57, %v1384_v46  ;;  %v1387_v49 = vpop.f32.mrb[18].mxu0 }
 0x2ab   : > { %v1388_v58 = vpop.f32.mrb[19].mxu0 }
 0x2ac   : > { %v933_v50 = vadd.f32 %v1386_v48, %v1931_v47  ;;  %v1389_v51 = vadd.f32 %v1388_v58, %v1387_v49 }
 0x2ae   : > { %996 = vst.msk [vmem:[%s1934_s13] sm:$0xff] %vm995_vm1, %v933_v50  ;;  %v936_v52 = vadd.f32 %v1389_v51, %v1931_v47 }
 0x2b0   : > { %997 = vst.msk [vmem:[%s1934_s13 + $0x8] sm:$0xff] %vm995_vm1, %v936_v52  ;;  %v1390_v42 = vpop.f32.mrb[20].mxu0 }
 0x2b1   : > { %v1391_v53 = vpop.f32.mrb[21].mxu0 }
 0x2b2   : > { %v1392_v54 = vadd.f32 %v1391_v53, %v1390_v42  ;;  %v1393_v55 = vpop.f32.mrb[22].mxu0 }
 0x2b3   : > { %v1394_v56 = vpop.f32.mrb[23].mxu0 }
 0x2b4   : > { %v941_v59 = vadd.f32 %v1392_v54, %v1931_v47  ;;  %v1395_v60 = vadd.f32 %v1394_v56, %v1393_v55 }
 0x2b6   : > { %998 = vst.msk [vmem:[%s1934_s13 + $0x10] sm:$0xff] %vm995_vm1, %v941_v59  ;;  %v944_v61 = vadd.f32 %v1395_v60, %v1931_v47 }
 0x2b8   : > { %999 = vst.msk [vmem:[%s1934_s13 + $0x18] sm:$0xff] %vm995_vm1, %v944_v61  ;;  %v1396_v62 = vpop.f32.mrb[24].mxu0 }
 0x2b9   : > { %v1397_v63 = vpop.f32.mrb[25].mxu0 }
 0x2ba   : > { %v1398_v0 = vadd.f32 %v1397_v63, %v1396_v62  ;;  %v1399_v1 = vpop.f32.mrb[26].mxu0 }
 0x2bb   : > { %v1400_v2 = vpop.f32.mrb[27].mxu0 }
 0x2bc   : > { %v949_v3 = vadd.f32 %v1398_v0, %v1931_v47  ;;  %v1401_v4 = vadd.f32 %v1400_v2, %v1399_v1 }
 0x2be   : > { %1000 = vst.msk [vmem:[%s1934_s13 + $0x20] sm:$0xff] %vm995_vm1, %v949_v3  ;;  %v952_v5 = vadd.f32 %v1401_v4, %v1931_v47 }
 0x2c0   : > { %1001 = vst.msk [vmem:[%s1934_s13 + $0x28] sm:$0xff] %vm995_vm1, %v952_v5  ;;  %v1402_v6 = vpop.f32.mrb[28].mxu0 }
 0x2c1   : > { %v1403_v7 = vpop.f32.mrb[29].mxu0 }
 0x2c2   : > { %v1404_v8 = vadd.f32 %v1403_v7, %v1402_v6  ;;  %v1405_v9 = vpop.f32.mrb[30].mxu0 }
 0x2c3   : > { %v1406_v10 = vpop.f32.mrb[31].mxu0 }
 0x2c4   : > { %v957_v11 = vadd.f32 %v1404_v8, %v1931_v47  ;;  %v1407_v12 = vadd.f32 %v1406_v10, %v1405_v9 }
 0x2c6   : > { %1002 = vst.msk [vmem:[%s1934_s13 + $0x30] sm:$0xff] %vm995_vm1, %v957_v11  ;;  %v960_v13 = vadd.f32 %v1407_v12, %v1931_v47 }
 0x2c8   : > { %1003 = vst.msk [vmem:[%s1934_s13 + $0x38] sm:$0xff] %vm995_vm1, %v960_v13  ;;  %v1408_v14 = vpop.f32.mrb[32].mxu0 }
 0x2c9   : > { %v1409_v15 = vpop.f32.mrb[33].mxu0 }
 0x2ca   : > { %v1410_v16 = vadd.f32 %v1409_v15, %v1408_v14  ;;  %v1411_v17 = vpop.f32.mrb[34].mxu0 }
 0x2cb   : > { %v1412_v18 = vpop.f32.mrb[35].mxu0 }
 0x2cc   : > { %v965_v19 = vadd.f32 %v1410_v16, %v1931_v47  ;;  %v1413_v20 = vadd.f32 %v1412_v18, %v1411_v17 }
 0x2ce   : > { %1004 = vst.msk [vmem:[%s1934_s13 + $0x40] sm:$0xff] %vm995_vm1, %v965_v19  ;;  %v968_v21 = vadd.f32 %v1413_v20, %v1931_v47 }
 0x2d0   : > { %1005 = vst.msk [vmem:[%s1934_s13 + $0x48] sm:$0xff] %vm995_vm1, %v968_v21  ;;  %v1414_v22 = vpop.f32.mrb[36].mxu0 }
 0x2d1   : > { %v1415_v23 = vpop.f32.mrb[37].mxu0 }
 0x2d2   : > { %v1416_v24 = vadd.f32 %v1415_v23, %v1414_v22  ;;  %v1417_v25 = vpop.f32.mrb[38].mxu0 }
 0x2d3   : > { %v1418_v26 = vpop.f32.mrb[39].mxu0 }
 0x2d4   : > { %v973_v27 = vadd.f32 %v1416_v24, %v1931_v47  ;;  %v1419_v28 = vadd.f32 %v1418_v26, %v1417_v25 }
 0x2d6   : > { %1006 = vst.msk [vmem:[%s1934_s13 + $0x50] sm:$0xff] %vm995_vm1, %v973_v27  ;;  %v976_v29 = vadd.f32 %v1419_v28, %v1931_v47 }
 0x2d8   : > { %1007 = vst.msk [vmem:[%s1934_s13 + $0x58] sm:$0xff] %vm995_vm1, %v976_v29  ;;  %v1420_v30 = vpop.f32.mrb[40].mxu0 }
 0x2d9   : > { %v1421_v31 = vpop.f32.mrb[41].mxu0 }
 0x2da   : > { %v1422_v32 = vadd.f32 %v1421_v31, %v1420_v30  ;;  %v1423_v33 = vpop.f32.mrb[42].mxu0 }
 0x2db   : > { %v1424_v34 = vpop.f32.mrb[43].mxu0 }
 0x2dc   : > { %v981_v35 = vadd.f32 %v1422_v32, %v1931_v47  ;;  %v1425_v36 = vadd.f32 %v1424_v34, %v1423_v33 }
 0x2de   : > { %1008 = vst.msk [vmem:[%s1934_s13 + $0x60] sm:$0xff] %vm995_vm1, %v981_v35  ;;  %v984_v37 = vadd.f32 %v1425_v36, %v1931_v47 }
 0x2e0   : > { %1009 = vst.msk [vmem:[%s1934_s13 + $0x68] sm:$0xff] %vm995_vm1, %v984_v37  ;;  %v1426_v38 = vpop.f32.mrb[44].mxu0 }
 0x2e1   : > { %v1427_v39 = vpop.f32.mrb[45].mxu0 }
 0x2e2   : > { %v1428_v40 = vadd.f32 %v1427_v39, %v1426_v38  ;;  %v1429_v41 = vpop.f32.mrb[46].mxu0  ;;  %1018 = sbr.rel (!%p1737_p4) target bundleno = 794 (0x31a), region = 52 }
 0x2e3   : > { %v1430_v43 = vpop.f32.mrb[47].mxu0 }
 0x2e4   : > { %v989_v44 = vadd.f32 %v1428_v40, %v1931_v47  ;;  %v1431_v45 = vadd.f32 %v1430_v43, %v1429_v41 }
 0x2e6   : > { %1010 = vst.msk [vmem:[%s1934_s13 + $0x70] sm:$0xff] %vm995_vm1, %v989_v44  ;;  %v992_v46 = vadd.f32 %v1431_v45, %v1931_v47 }
 0x2e8   : > { %1011 = vst.msk [vmem:[%s1934_s13 + $0x78] sm:$0xff] %vm995_vm1, %v992_v46 }
 0x2e9   : > { %s2099_s24 = smov (!%p1021_p8, %s1020_s24), 16 }
 0x2ea   : > { %s1340_s18 = sshll.u32 %s2099_s24, 7 }
 0x2eb   : > { %p1343_p9 = scmp.eq.s32.totalorder %s1340_s18, 0 }
 0x2ec   : > { %s1996_s19 = sshrl.u32 (!%p1343_p9), %s2099_s24, 4 }
 0x2ed   : > { %1029 = sbr.rel (%p1343_p9) target bundleno = 794 (0x31a), region = 56  ;;  %p1344_p10 = scmp.le.s32.totalorder (!%p1343_p9), %s1996_s19, 0 }
 0x2f4   : > { %1243 = sbr.rel (%p1344_p10) target bundleno = 773 (0x305), region = 132  ;;  %s2092_s27 = smov (!%p1344_p10), %s1990_s17 }
 0x2f5   : > { %s2093_s9 = smov (!%p1344_p10), %s1934_s13  ;;  %s2005_s12 = smov (!%p1344_p10), 0  }
 0x2f6   : > { %s2007_s20 = smov (!%p1344_p10), 0  }
 0x2fb LB: >> { %v1121_v47 = vld [vmem:[%s1645_s9] sm:$0xff]  ;;  %v1123_v57 = vld [vmem:[%s1645_s9 + $0x8] sm:$0xff]  ;;  %v1125_v48 = vld [vmem:[%s1645_s9 + $0x10] sm:$0xff]  ;;  %s1153_s10 = sadd.s32 1, %s1649_s12  ;;  %s1115_s20 = sadd.s32 1, %s1653_s20   ;;  %s1653_s20 = sphi %s2007_s20, %s1115_s20   ;;  %s1649_s12 = sphi %s2005_s12, %s2094_s12   ;;  %s1645_s9 = sphi %s2093_s9, %s1158_s9   ;;  %s1641_s27 = sphi %s2092_s27, %s1159_s27  }
 0x2fc   : >> { %1122 = vst [vmem:[%s1641_s27] sm:$0xff] %v1121_v47  ;;  %1124 = vst [vmem:[%s1641_s27 + $0x8] sm:$0xff] %v1123_v57  ;;  %v1127_v49 = vld [vmem:[%s1645_s9 + $0x18] sm:$0xff]  ;;  %v1129_v58 = vld [vmem:[%s1645_s9 + $0x20] sm:$0xff]  ;;  %p1154_p11 = scmp.ge.s32.totalorder %s1153_s10, %s1996_s19  ;;  %p1114_p12 = scmp.ge.s32.totalorder %s1115_s20, %s1996_s19 }
 0x2fd   : >> { %1126 = vst [vmem:[%s1641_s27 + $0x10] sm:$0xff] %v1125_v48  ;;  %v1131_v50 = vld [vmem:[%s1645_s9 + $0x28] sm:$0xff]  ;;  %1128 = vst [vmem:[%s1641_s27 + $0x18] sm:$0xff] %v1127_v49  ;;  %v1133_v51 = vld [vmem:[%s1645_s9 + $0x30] sm:$0xff] }
 0x2fe   : >> { %1130 = vst [vmem:[%s1641_s27 + $0x20] sm:$0xff] %v1129_v58  ;;  %1132 = vst [vmem:[%s1641_s27 + $0x28] sm:$0xff] %v1131_v50  ;;  %v1135_v52 = vld [vmem:[%s1645_s9 + $0x38] sm:$0xff]  ;;  %v1137_v42 = vld [vmem:[%s1645_s9 + $0x40] sm:$0xff]  ;;  %s2101_s10 = smov (%p1154_p11, %s1153_s10), 0  ;;  %1117 = sbr.rel (!%p1114_p12) target bundleno = 763 (0x2fb), region = 138 }
 0x2ff   : >> { %1134 = vst [vmem:[%s1641_s27 + $0x30] sm:$0xff] %v1133_v51  ;;  %1136 = vst [vmem:[%s1641_s27 + $0x38] sm:$0xff] %v1135_v52  ;;  %v1139_v53 = vld [vmem:[%s1645_s9 + $0x48] sm:$0xff]  ;;  %v1141_v54 = vld [vmem:[%s1645_s9 + $0x50] sm:$0xff]  ;;  %s1345_s21 = sshll.u32 %s2101_s10, 7  ;;  %s2094_s12 = smov %s2101_s10 }
 0x300   : >> { %1138 = vst [vmem:[%s1641_s27 + $0x40] sm:$0xff] %v1137_v42  ;;  %v1143_v55 = vld [vmem:[%s1645_s9 + $0x58] sm:$0xff]  ;;  %1140 = vst [vmem:[%s1641_s27 + $0x48] sm:$0xff] %v1139_v53  ;;  %v1145_v56 = vld [vmem:[%s1645_s9 + $0x60] sm:$0xff] }
 0x301   : >> { %1142 = vst [vmem:[%s1641_s27 + $0x50] sm:$0xff] %v1141_v54  ;;  %1144 = vst [vmem:[%s1641_s27 + $0x58] sm:$0xff] %v1143_v55  ;;  %v1147_v59 = vld [vmem:[%s1645_s9 + $0x68] sm:$0xff]  ;;  %v1149_v60 = vld [vmem:[%s1645_s9 + $0x70] sm:$0xff] }
 0x302   : >> { %1146 = vst [vmem:[%s1641_s27 + $0x60] sm:$0xff] %v1145_v56  ;;  %1148 = vst [vmem:[%s1641_s27 + $0x68] sm:$0xff] %v1147_v59  ;;  %v1151_v61 = vld [vmem:[%s1645_s9 + $0x78] sm:$0xff]  ;;  %s1158_s9 = scalar_lea.vmem %s1934_s13, %s1345_s21 [#allocation2]  }
 0x303   : >> { %1150 = vst [vmem:[%s1641_s27 + $0x70] sm:$0xff] %v1149_v60  ;;  %1152 = vst [vmem:[%s1641_s27 + $0x78] sm:$0xff] %v1151_v61  ;;  %s1159_s27 = scalar_lea.vmem %s1990_s17, %s1345_s21  }
 0x305 PF: > { %s2065_s22 = sand.u32 15, %s2099_s24   ;;  %s1356_s23 = sshll.u32 %s1996_s19, 7 }
 0x306   : > { %s1164_s26 = scalar_lea.vmem %s1934_s13, %s1356_s23 [#allocation2]   ;;  %s1166_s29 = scalar_lea.vmem %s1990_s17, %s1356_s23  }
 0x307   : > { %p1350_p13 = scmp.le.s32.totalorder %s2065_s22, 0 }
 0x308   : > { %s1655_s30 = smov (!%p1350_p13), %s1166_s29   ;;  %s1659_s11 = smov (!%p1350_p13), %s1164_s26  }
 0x309   : > { %1257 = sbr.rel (%p1350_p13) target bundleno = 794 (0x31a), region = 143  ;;  %s1663_s14 = smov (!%p1350_p13), 0  }
 0x30a   : > { %s1667_s15 = smov (!%p1350_p13), 0  }
 0x310 LB: >> { %v1176_v62 = vld [vmem:[%s1661_s11] sm:$0xff]  ;;  %s1178_s24 = sadd.s32 1, %s1665_s14  ;;  %s1170_s15 = sadd.s32 1, %s1669_s15   ;;  %s1669_s15 = sphi %s1667_s15, %s1170_s15   ;;  %s1665_s14 = sphi %s1663_s14, %s1664_s14   ;;  %s1661_s11 = sphi %s1659_s11, %s1183_s11   ;;  %s1657_s30 = sphi %s1655_s30, %s1184_s30  }
 0x311   : >> { %1177 = vst [vmem:[%s1657_s30] sm:$0xff] %v1176_v62  ;;  %p1179_p0 = scmp.ge.s32.totalorder %s1178_s24, %s2065_s22  ;;  %p1169_p1 = scmp.ge.s32.totalorder %s1170_s15, %s2065_s22 }
 0x313   : >> { %s2103_s24 = smov (%p1179_p0, %s1178_s24), 0  ;;  %1172 = sbr.rel (!%p1169_p1) target bundleno = 784 (0x310), region = 149 }
 0x314   : >> { %s1351_s13 = sshll.u32 %s2103_s24, 3  ;;  %s1664_s14 = smov %s2103_s24  }
 0x315   : >> { %s1183_s11 = scalar_lea.vmem %s1164_s26, %s1351_s13 [#allocation2]   ;;  %s1184_s30 = scalar_lea.vmem %s1166_s29, %s1351_s13  }
 0x31a PF: > { %p14_p2 = scmp.ge.s32.totalorder %s1727_s28, 4   ;;  %s2095_s24 = smov %s1633_s25 }
 0x31b   : > { %s2096_s25 = smov %s1735_s8  ;;  %s2097_s26 = smov %s1727_s28 }
 0x31c   :  { %16 = sbr.rel (!%p14_p2) target bundleno = 2 (0x2), region = 160 }

</bundles_post_ra>
